<compile_context>
chip_gen: v6e
topology: v6e:2x2x1
jax: 0.10.0
libtpu: 0.0.40
codegen_flags: <defaults>
</compile_context>

<pallas_src>
import jax
import jax.numpy as jnp
from jax.experimental import pallas as pl
from jax.experimental.pallas import tpu as pltpu

EPS = 1e-5
_INV_SQRT2 = 0.7071067811865476


def _round_up(n: int, m: int) -> int:
    return ((n + m - 1) // m) * m


def _choose_tb(B: int, tb_max: int, min_steps: int) -> int:
    """Pick a batch tile: multiple of 8 (or == B for tiny B), capped so the grid has
    at least `min_steps` steps (pipeline depth per TC; both v7x TCs get work)."""
    if B <= 8:
        return B                       # full-dim block, exempt from sublane rule
    tb = min(tb_max, _round_up(pl.cdiv(B, min_steps), 8))
    return max(8, min(tb, _round_up(B, 8)))


def _forward_block_kernel(x_ref, gamma_ref, beta_ref, w1_ref, b1_ref,
                          w2_ref, b2_ref, o_ref):
    # ---- GroupNorm(num_groups=1), per row over the real in_dim lanes ----
    # Two-pass statistics (PyTorch-style): var >= 0 by construction, no rsqrt NaN.
    x = x_ref[...].astype(jnp.float32)                        # (tb, in_dim)
    mean = jnp.mean(x, axis=-1, keepdims=True)                # (tb, 1)
    xc = x - mean
    var = jnp.mean(xc * xc, axis=-1, keepdims=True)
    xn = xc * jax.lax.rsqrt(var + EPS)
    xn = xn * gamma_ref[...] + beta_ref[...]

    # ---- Linear(in -> hid) + exact (erf) GELU; f32 MXU, f32 accumulate ----
    h = jnp.dot(xn, w1_ref[...], preferred_element_type=jnp.float32) + b1_ref[...]
    h = 0.5 * h * (1.0 + jax.lax.erf(h * _INV_SQRT2))         # nn.GELU() default (erf)

    # ---- Linear(hid -> out) + Identity ----
    o = jnp.dot(h, w2_ref[...], preferred_element_type=jnp.float32) + b2_ref[...]
    o_ref[...] = o.astype(o_ref.dtype)


def forward_block(x, gamma, beta, w1, b1, w2, b2, *, tb=512, min_steps=4):
    """x: (B, in_dim). gamma/beta: (1, in_dim). w1: (in_dim, hid). b1: (1, hid).
    w2: (hid, out). b2: (1, out). Returns (B, out). Weights are pre-transposed
    (in, out): the kernel computes x @ W + b == PyTorch's x @ W.T + b.
    All parameters are consumed as-is (no per-call padding/casting)."""
    B, in_dim = x.shape
    hid = w1.shape[1]
    out_dim = w2.shape[1]

    tb = _choose_tb(B, tb, min_steps)
    grid = (pl.cdiv(B, tb),)                 # final partial block masked by Pallas
    const = lambda i: (0, 0)                 # params: same (only) block every step

    cost = pl.CostEstimate(
        flops=int(2 * B * (in_dim * hid + hid * out_dim) + 10 * B * in_dim),
        transcendentals=int(B * hid + B),    # erf per hidden element + rsqrt per row
        bytes_accessed=int(B * (in_dim + out_dim) * 4
                           + (in_dim * hid + hid * out_dim) * 4
                           + (2 * in_dim + hid + out_dim) * 4),
    )

    return pl.pallas_call(
        _forward_block_kernel,
        out_shape=jax.ShapeDtypeStruct((B, out_dim), x.dtype),
        grid_spec=pltpu.PrefetchScalarGridSpec(
            num_scalar_prefetch=0,
            grid=grid,
            in_specs=[
                pl.BlockSpec((tb, in_dim), lambda i: (i, 0)),   # x: tiled over batch
                pl.BlockSpec((1, in_dim), const),               # gamma
                pl.BlockSpec((1, in_dim), const),               # beta
                pl.BlockSpec((in_dim, hid), const),             # w1 (VMEM-resident)
                pl.BlockSpec((1, hid), const),                  # b1
                pl.BlockSpec((hid, out_dim), const),            # w2 (VMEM-resident)
                pl.BlockSpec((1, out_dim), const),              # b2
            ],
            out_specs=pl.BlockSpec((tb, out_dim), lambda i: (i, 0)),
        ),
        compiler_params=pltpu.CompilerParams(
            dimension_semantics=("parallel",),        # batch shards across v7x's 2 TCs
            vmem_limit_bytes=32 * 1024 * 1024,        # explicit budget; fits all gens
        ),
        cost_estimate=cost,
    )(x, gamma, beta, w1, b1, w2, b2)


def reference_forward(x, gamma, beta, w1, b1, w2, b2):
    # Pure-JAX (f32, exact erf) reference of the PyTorch module.
    x32 = x.astype(jnp.float32)
    mean = jnp.mean(x32, axis=-1, keepdims=True)
    var = jnp.mean((x32 - mean) ** 2, axis=-1, keepdims=True)
    xn = (x32 - mean) / jnp.sqrt(var + EPS) * gamma + beta
    h = xn @ w1 + b1
    h = 0.5 * h * (1.0 + jax.lax.erf(h * _INV_SQRT2))
    return (h @ w2 + b2).astype(x.dtype)


if __name__ == "__main__":
    # Small, module-consistent shapes: (batch, in_dim) rows; hid_dim=256 is the module
    # default; out_dim == in_dim.
    B, in_dim, hid_dim, out_dim = 512, 32, 256, 32

    key = jax.random.PRNGKey(0)
    kx, kg, kb, kw1, kb1, kw2, kb2, kx2 = jax.random.split(key, 8)

    x = jax.random.normal(kx, (B, in_dim), dtype=jnp.float32)

    # Deterministic synthetic parameters (shapes follow nn.GroupNorm / nn.Linear).
    gamma = 1.0 + 0.1 * jax.random.normal(kg, (1, in_dim), dtype=jnp.float32)
    beta = 0.1 * jax.random.normal(kb, (1, in_dim), dtype=jnp.float32)
    w1 = jax.random.normal(kw1, (in_dim, hid_dim), dtype=jnp.float32) / jnp.sqrt(in_dim)
    b1 = 0.01 * jax.random.normal(kb1, (1, hid_dim), dtype=jnp.float32)
    w2 = jax.random.normal(kw2, (hid_dim, out_dim), dtype=jnp.float32) / jnp.sqrt(hid_dim)
    b2 = 0.01 * jax.random.normal(kb2, (1, out_dim), dtype=jnp.float32)

    out = jax.block_until_ready(forward_block(x, gamma, beta, w1, b1, w2, b2))
    ref = reference_forward(x, gamma, beta, w1, b1, w2, b2)
    assert out.shape == (B, out_dim)
    assert jnp.allclose(out, ref, atol=2e-2, rtol=2e-2), "mismatch vs reference (B=512)"

    # Exercise the masked partial final batch block (B not a multiple of the tile).
    B2 = 200
    x2 = jax.random.normal(kx2, (B2, in_dim), dtype=jnp.float32)
    out2 = jax.block_until_ready(forward_block(x2, gamma, beta, w1, b1, w2, b2))
    ref2 = reference_forward(x2, gamma, beta, w1, b1, w2, b2)
    assert out2.shape == (B2, out_dim)
    assert jnp.allclose(out2, ref2, atol=2e-2, rtol=2e-2), "mismatch vs reference (B=200)"

    print("KERNEL_OK")
</pallas_src>

<mosaic_0001>
module attributes {stable_mosaic.version = 11 : i64} {
  func.func @_forward_block_kernel(%arg0: i32, %arg1: memref<128x32xf32, #tpu.memory_space<vmem>>, %arg2: memref<1x32xf32, #tpu.memory_space<vmem>>, %arg3: memref<1x32xf32, #tpu.memory_space<vmem>>, %arg4: memref<32x256xf32, #tpu.memory_space<vmem>>, %arg5: memref<1x256xf32, #tpu.memory_space<vmem>>, %arg6: memref<256x32xf32, #tpu.memory_space<vmem>>, %arg7: memref<1x32xf32, #tpu.memory_space<vmem>>, %arg8: memref<128x32xf32, #tpu.memory_space<vmem>>) attributes {dimension_semantics = [#tpu.dimension_semantics<parallel>], iteration_bounds = array<i64: 4>, scalar_prefetch = 0 : i64, scratch_operands = 0 : i64, tpu.core_type = #tpu.core_type<tc>, window_params = [{transform_indices = @transform_0, window_bounds = array<i64: 128, 32>}, {pipeline_mode = #tpu.pipeline_mode<synchronous>, transform_indices = @transform_1, window_bounds = array<i64: 1, 32>}, {pipeline_mode = #tpu.pipeline_mode<synchronous>, transform_indices = @transform_2, window_bounds = array<i64: 1, 32>}, {pipeline_mode = #tpu.pipeline_mode<synchronous>, transform_indices = @transform_3, window_bounds = array<i64: 32, 256>}, {pipeline_mode = #tpu.pipeline_mode<synchronous>, transform_indices = @transform_4, window_bounds = array<i64: 1, 256>}, {pipeline_mode = #tpu.pipeline_mode<synchronous>, transform_indices = @transform_5, window_bounds = array<i64: 256, 32>}, {pipeline_mode = #tpu.pipeline_mode<synchronous>, transform_indices = @transform_6, window_bounds = array<i64: 1, 32>}, {transform_indices = @transform_7, window_bounds = array<i64: 128, 32>}]} {
    %c0 = arith.constant 0 : index
    %c0_0 = arith.constant 0 : index
    %0 = vector.load %arg1[%c0, %c0_0] : memref<128x32xf32, #tpu.memory_space<vmem>>, vector<128x32xf32>
    %cst = arith.constant dense<0.000000e+00> : vector<128xf32>
    %1 = vector.multi_reduction <add>, %0, %cst [1] : vector<128x32xf32> to vector<128xf32>
    %2 = vector.shape_cast %1 : vector<128xf32> to vector<128x1xf32>
    %cst_1 = arith.constant 3.200000e+01 : f32
    %3 = vector.broadcast %cst_1 : f32 to vector<128x1xf32>
    %4 = arith.divf %2, %3 : vector<128x1xf32>
    %5 = vector.broadcast %4 : vector<128x1xf32> to vector<128x32xf32>
    %6 = arith.subf %0, %5 : vector<128x32xf32>
    %7 = arith.mulf %6, %6 : vector<128x32xf32>
    %cst_2 = arith.constant dense<0.000000e+00> : vector<128xf32>
    %8 = vector.multi_reduction <add>, %7, %cst_2 [1] : vector<128x32xf32> to vector<128xf32>
    %9 = vector.shape_cast %8 : vector<128xf32> to vector<128x1xf32>
    %cst_3 = arith.constant 3.200000e+01 : f32
    %10 = vector.broadcast %cst_3 : f32 to vector<128x1xf32>
    %11 = arith.divf %9, %10 : vector<128x1xf32>
    %cst_4 = arith.constant 9.99999974E-6 : f32
    %12 = vector.broadcast %cst_4 : f32 to vector<128x1xf32>
    %13 = arith.addf %11, %12 : vector<128x1xf32>
    %14 = math.rsqrt %13 : vector<128x1xf32>
    %15 = vector.broadcast %14 : vector<128x1xf32> to vector<128x32xf32>
    %16 = arith.mulf %6, %15 : vector<128x32xf32>
    %c0_5 = arith.constant 0 : index
    %c0_6 = arith.constant 0 : index
    %17 = vector.load %arg2[%c0_5, %c0_6] : memref<1x32xf32, #tpu.memory_space<vmem>>, vector<1x32xf32>
    %18 = vector.broadcast %17 : vector<1x32xf32> to vector<128x32xf32>
    %19 = arith.mulf %16, %18 : vector<128x32xf32>
    %c0_7 = arith.constant 0 : index
    %c0_8 = arith.constant 0 : index
    %20 = vector.load %arg3[%c0_7, %c0_8] : memref<1x32xf32, #tpu.memory_space<vmem>>, vector<1x32xf32>
    %21 = vector.broadcast %20 : vector<1x32xf32> to vector<128x32xf32>
    %22 = arith.addf %19, %21 : vector<128x32xf32>
    %c0_9 = arith.constant 0 : index
    %c0_10 = arith.constant 0 : index
    %23 = vector.load %arg4[%c0_9, %c0_10] : memref<32x256xf32, #tpu.memory_space<vmem>>, vector<32x256xf32>
    %cst_11 = arith.constant dense<0.000000e+00> : vector<128x256xf32>
    %24 = tpu.matmul %22, %23, %cst_11 {dimension_numbers = #tpu.dot_dimension_numbers<[1], [0], [0], [1], [0, 0, 1, 1], [], []>} : vector<128x32xf32>, vector<32x256xf32>, vector<128x256xf32> -> vector<128x256xf32>
    %c0_12 = arith.constant 0 : index
    %c0_13 = arith.constant 0 : index
    %25 = vector.load %arg5[%c0_12, %c0_13] : memref<1x256xf32, #tpu.memory_space<vmem>>, vector<1x256xf32>
    %26 = vector.broadcast %25 : vector<1x256xf32> to vector<128x256xf32>
    %27 = arith.addf %24, %26 : vector<128x256xf32>
    %cst_14 = arith.constant 5.000000e-01 : f32
    %28 = vector.broadcast %cst_14 : f32 to vector<128x256xf32>
    %29 = arith.mulf %28, %27 : vector<128x256xf32>
    %cst_15 = arith.constant 0.707106769 : f32
    %30 = vector.broadcast %cst_15 : f32 to vector<128x256xf32>
    %31 = arith.mulf %27, %30 : vector<128x256xf32>
    %32 = math.erf %31 : vector<128x256xf32>
    %cst_16 = arith.constant 1.000000e+00 : f32
    %33 = vector.broadcast %cst_16 : f32 to vector<128x256xf32>
    %34 = arith.addf %33, %32 : vector<128x256xf32>
    %35 = arith.mulf %29, %34 : vector<128x256xf32>
    %c0_17 = arith.constant 0 : index
    %c0_18 = arith.constant 0 : index
    %36 = vector.load %arg6[%c0_17, %c0_18] : memref<256x32xf32, #tpu.memory_space<vmem>>, vector<256x32xf32>
    %cst_19 = arith.constant dense<0.000000e+00> : vector<128x32xf32>
    %37 = tpu.matmul %35, %36, %cst_19 {dimension_numbers = #tpu.dot_dimension_numbers<[1], [0], [0], [1], [0, 0, 1, 1], [], []>} : vector<128x256xf32>, vector<256x32xf32>, vector<128x32xf32> -> vector<128x32xf32>
    %c0_20 = arith.constant 0 : index
    %c0_21 = arith.constant 0 : index
    %38 = vector.load %arg7[%c0_20, %c0_21] : memref<1x32xf32, #tpu.memory_space<vmem>>, vector<1x32xf32>
    %39 = vector.broadcast %38 : vector<1x32xf32> to vector<128x32xf32>
    %40 = arith.addf %37, %39 : vector<128x32xf32>
    %c0_22 = arith.constant 0 : index
    %c0_23 = arith.constant 0 : index
    %41 = vector.load %arg8[%c0_22, %c0_23] : memref<128x32xf32, #tpu.memory_space<vmem>>, vector<128x32xf32>
    tpu.vector_store %arg8[%c0_22, %c0_23], %40 {strides = array<i32>} : memref<128x32xf32, #tpu.memory_space<vmem>>, vector<128x32xf32>,
    return
  }
  func.func @transform_0(%arg0: i32) -> (i32, i32) {
    %c0_i32 = arith.constant 0 : i32
    %c0_i32_0 = arith.constant 0 : i32
    return %arg0, %c0_i32 : i32, i32
  }
  func.func @transform_1(%arg0: i32) -> (i32, i32) {
    %c0_i32 = arith.constant 0 : i32
    %c0_i32_0 = arith.constant 0 : i32
    %c0_i32_1 = arith.constant 0 : i32
    return %c0_i32, %c0_i32_0 : i32, i32
  }
  func.func @transform_2(%arg0: i32) -> (i32, i32) {
    %c0_i32 = arith.constant 0 : i32
    %c0_i32_0 = arith.constant 0 : i32
    %c0_i32_1 = arith.constant 0 : i32
    return %c0_i32, %c0_i32_0 : i32, i32
  }
  func.func @transform_3(%arg0: i32) -> (i32, i32) {
    %c0_i32 = arith.constant 0 : i32
    %c0_i32_0 = arith.constant 0 : i32
    %c0_i32_1 = arith.constant 0 : i32
    return %c0_i32, %c0_i32_0 : i32, i32
  }
  func.func @transform_4(%arg0: i32) -> (i32, i32) {
    %c0_i32 = arith.constant 0 : i32
    %c0_i32_0 = arith.constant 0 : i32
    %c0_i32_1 = arith.constant 0 : i32
    return %c0_i32, %c0_i32_0 : i32, i32
  }
  func.func @transform_5(%arg0: i32) -> (i32, i32) {
    %c0_i32 = arith.constant 0 : i32
    %c0_i32_0 = arith.constant 0 : i32
    %c0_i32_1 = arith.constant 0 : i32
    return %c0_i32, %c0_i32_0 : i32, i32
  }
  func.func @transform_6(%arg0: i32) -> (i32, i32) {
    %c0_i32 = arith.constant 0 : i32
    %c0_i32_0 = arith.constant 0 : i32
    %c0_i32_1 = arith.constant 0 : i32
    return %c0_i32, %c0_i32_0 : i32, i32
  }
  func.func @transform_7(%arg0: i32) -> (i32, i32) {
    %c0_i32 = arith.constant 0 : i32
    %c0_i32_0 = arith.constant 0 : i32
    return %arg0, %c0_i32 : i32, i32
  }
}

</mosaic_0001>

<bundles_post_ra>
// kernel: tpu_custom_call.1
= control target key start
LH: loop header
LB: loop body
LE: loop exit
PB: predicated region body
PF: predicated region fallthrough
CT: control target
= control target key end

     0   :  { %s1495_s24 = smov 0   ;;  %s2081_s0 = inlined_call_operand.vmem [shape: f32[512,32], index: 0, kind: input, shape index: {}]   ;;  %s2082_s1 = inlined_call_operand.vmem [shape: f32[1,32], index: 1, kind: input, shape index: {}]   ;;  %s2083_s2 = inlined_call_operand.vmem [shape: f32[1,32], index: 2, kind: input, shape index: {}]   ;;  %s2084_s3 = inlined_call_operand.vmem [shape: f32[32,256], index: 3, kind: input, shape index: {}]   ;;  %s2085_s4 = inlined_call_operand.vmem [shape: f32[1,256], index: 4, kind: input, shape index: {}]   ;;  %s2086_s5 = inlined_call_operand.vmem [shape: f32[256,32], index: 5, kind: input, shape index: {}]   ;;  %s2087_s6 = inlined_call_operand.vmem [shape: f32[1,32], index: 6, kind: input, shape index: {}]   ;;  %s2088_s7 = inlined_call_operand.vmem [shape: f32[512,32], index: 7, kind: output, shape index: {}]  }
   0x1 LB: > { %s1199_s25 = sadd.s32 4294967295, %s1452_s24   ;;  %p1203_p0 = scmp.ge.s32.totalorder %s1452_s24, 1  ;;  %s1452_s24 = sphi %s1495_s24, %s17_s24  }
   0x2   : > { %p238_p1 = scmp.lt.s32.totalorder %s1452_s24, 5 }
   0x4   : > { %p239_p2 = pnand %p1203_p0, %p238_p1 }
   0x5   : > { %s1204_s26 = sshll.u32 (!%p239_p2), %s1199_s25, 4 }
   0x6   : > { %242 = sbr.rel (%p239_p2) target bundleno = 801 (0x321), region = 48  ;;  %p271_p3 = scmp.lt.s32.totalorder (!%p239_p2), %s1204_s26, 63 }
   0xb   : > { %s2090_s26 = smov (!%p271_p3, %s1204_s26), 63  ;;  %vm298_vm0 = vcmask 261120  }
   0xc   : > { %s1205_s27 = sshll.u32 %s2090_s26, 3 }
   0xd   : > { %s1511_s30 = scalar_lea.vmem %s2081_s0, %s1205_s27  ;;  %s2028_s18 = scalar_lea.vmem %s2088_s7, %s1205_s27 }
   0xe   : > { %v282_v0 = vld [vmem:[%s1511_s30] sm:$0xff]  ;;  %v284_v1 = vld [vmem:[%s1511_s30 + $0x10] sm:$0xff]  ;;  %v283_v2 = vld [vmem:[%s1511_s30 + $0x8] sm:$0xff] }
   0xf   : > { %v299_v3 = vsel %vm298_vm0, %v282_v0, 0.0  ;;  %v305_v4 = vsel %vm298_vm0, %v284_v1, 0.0  ;;  %v285_v5 = vld [vmem:[%s1511_s30 + $0x18] sm:$0xff]  ;;  %v302_v6 = vsel %vm298_vm0, %v283_v2, 0.0  ;;  %v286_v8 = vld [vmem:[%s1511_s30 + $0x20] sm:$0xff]  ;;  %v287_v9 = vld [vmem:[%s1511_s30 + $0x28] sm:$0xff] }
  0x10   : > { %300 = vadd.xlane.f32.xlu0 %v299_v3  ;;  %306 = vadd.xlane.f32.xlu1 %v305_v4  ;;  %v308_v7 = vsel %vm298_vm0, %v285_v5, 0.0  ;;  %v311_v10 = vsel %vm298_vm0, %v286_v8, 0.0  ;;  %v314_v11 = vsel %vm298_vm0, %v287_v9, 0.0  ;;  %v1526_v12 = vld [vmem:[%s1511_s30 + $0x30] sm:$0xff]  ;;  %v1529_v13 = vld [vmem:[%s1511_s30 + $0x38] sm:$0xff]  ;;  %v1536_v16 = vld [vmem:[%s1511_s30 + $0x40] sm:$0xff] }
  0x11   : > { %v317_v14 = vsel %vm298_vm0, %v1526_v12, 0.0  ;;  %v320_v15 = vsel %vm298_vm0, %v1529_v13, 0.0  ;;  %v1539_v17 = vld [vmem:[%s1511_s30 + $0x48] sm:$0xff]  ;;  %v323_v18 = vsel %vm298_vm0, %v1536_v16, 0.0  ;;  %v1546_v20 = vld [vmem:[%s1511_s30 + $0x50] sm:$0xff]  ;;  %v1549_v21 = vld [vmem:[%s1511_s30 + $0x58] sm:$0xff] }
  0x12   : > { %v326_v19 = vsel %vm298_vm0, %v1539_v17, 0.0  ;;  %v329_v22 = vsel %vm298_vm0, %v1546_v20, 0.0  ;;  %v332_v23 = vsel %vm298_vm0, %v1549_v21, 0.0  ;;  %v1556_v24 = vld [vmem:[%s1511_s30 + $0x60] sm:$0xff]  ;;  %v1559_v25 = vld [vmem:[%s1511_s30 + $0x68] sm:$0xff]  ;;  %v1566_v28 = vld [vmem:[%s1511_s30 + $0x70] sm:$0xff] }
  0x13   : > { %v335_v26 = vsel %vm298_vm0, %v1556_v24, 0.0  ;;  %v338_v27 = vsel %vm298_vm0, %v1559_v25, 0.0  ;;  %v1569_v29 = vld [vmem:[%s1511_s30 + $0x78] sm:$0xff]  ;;  %v341_v30 = vsel %vm298_vm0, %v1566_v28, 0.0 }
  0x14   : > { %303 = vadd.xlane.f32.xlu0 %v302_v6  ;;  %309 = vadd.xlane.f32.xlu1 %v308_v7  ;;  %v344_v31 = vsel %vm298_vm0, %v1569_v29, 0.0 }
  0x18   : > { %312 = vadd.xlane.f32.xlu0 %v311_v10  ;;  %315 = vadd.xlane.f32.xlu1 %v314_v11 }
  0x1c   : > { %318 = vadd.xlane.f32.xlu0 %v317_v14  ;;  %321 = vadd.xlane.f32.xlu1 %v320_v15 }
  0x20   : > { %324 = vadd.xlane.f32.xlu0 %v323_v18  ;;  %327 = vadd.xlane.f32.xlu1 %v326_v19 }
  0x24   : > { %330 = vadd.xlane.f32.xlu0 %v329_v22  ;;  %333 = vadd.xlane.f32.xlu1 %v332_v23 }
  0x28   : > { %336 = vadd.xlane.f32.xlu0 %v335_v26  ;;  %339 = vadd.xlane.f32.xlu1 %v338_v27 }
  0x2c   : > { %342 = vadd.xlane.f32.xlu0 %v341_v30  ;;  %345 = vadd.xlane.f32.xlu1 %v344_v31 }
  0x99   : > { %v301_v32 = vpop.xlane.xlu0 %300  ;;  %v307_v33 = vpop.xlane.xlu1 %306 }
  0x9a   : > { %v348_v34 = vmul.f32 0.03125, %v301_v32  ;;  %v350_v35 = vmul.f32 0.03125, %v307_v33 }
  0x9c   : > { %v1575_v36 = vsub.f32 %v282_v0, %v348_v34  ;;  %v1577_v37 = vsub.f32 %v284_v1, %v350_v35 }
  0x9d   : > { %v304_v38 = vpop.xlane.xlu0 %303  ;;  %v310_v39 = vpop.xlane.xlu1 %309 }
  0x9e   : > { %v349_v40 = vmul.f32 0.03125, %v304_v38  ;;  %v351_v41 = vmul.f32 0.03125, %v310_v39  ;;  %v380_v42 = vmul.f32 %v1575_v36, %v1575_v36  ;;  %v382_v43 = vmul.f32 %v1577_v37, %v1577_v37 }
  0xa0   : > { %v1583_v44 = vsub.f32 %v283_v2, %v349_v40  ;;  %v1585_v45 = vsub.f32 %v285_v5, %v351_v41  ;;  %v396_v46 = vsel %vm298_vm0, %v380_v42, 0.0  ;;  %v402_v49 = vsel %vm298_vm0, %v382_v43, 0.0 }
  0xa1   : > { %397 = vadd.xlane.f32.xlu0 %v396_v46  ;;  %v313_v47 = vpop.xlane.xlu0 %312  ;;  %v316_v48 = vpop.xlane.xlu1 %315 }
  0xa2   : > { %v352_v50 = vmul.f32 0.03125, %v313_v47  ;;  %v353_v51 = vmul.f32 0.03125, %v316_v48  ;;  %v381_v52 = vmul.f32 %v1583_v44, %v1583_v44  ;;  %v383_v53 = vmul.f32 %v1585_v45, %v1585_v45 }
  0xa4   : > { %v1593_v54 = vsub.f32 %v286_v8, %v352_v50  ;;  %v1595_v55 = vsub.f32 %v287_v9, %v353_v51  ;;  %v399_v56 = vsel %vm298_vm0, %v381_v52, 0.0  ;;  %v405_v59 = vsel %vm298_vm0, %v383_v53, 0.0  ;;  %v559_v53 = vld [vmem:[%s2084_s3 + $0x28] sm:$0xff] }
  0xa5   : > { %403 = vadd.xlane.f32.xlu0 %v402_v49  ;;  %400 = vadd.xlane.f32.xlu1 %v399_v56  ;;  %v319_v57 = vpop.xlane.xlu0 %318  ;;  %v322_v58 = vpop.xlane.xlu1 %321 }
  0xa6   : > { %v354_v60 = vmul.f32 0.03125, %v319_v57  ;;  %v355_v61 = vmul.f32 0.03125, %v322_v58  ;;  %v384_v62 = vmul.f32 %v1593_v54, %v1593_v54  ;;  %v385_v63 = vmul.f32 %v1595_v55, %v1595_v55  ;;  %v558_v57 = vld [vmem:[%s2084_s3 + $0x20] sm:$0xff]  ;;  %v557_v58 = vld [vmem:[%s2084_s3 + $0x18] sm:$0xff] }
  0xa8   : > { %v1604_v0 = vsub.f32 %v1526_v12, %v354_v60  ;;  %v1607_v1 = vsub.f32 %v1529_v13, %v355_v61  ;;  %v408_v2 = vsel %vm298_vm0, %v384_v62, 0.0  ;;  %v411_v5 = vsel %vm298_vm0, %v385_v63, 0.0  ;;  %v555_v60 = vld [vmem:[%s2084_s3 + $0x8] sm:$0xff]  ;;  %v554_v61 = vld [vmem:[%s2084_s3] sm:$0xff]  ;;  %v974_v63 = vld [vmem:[%s2086_s5 + $0xf8] sm:$0xff] }
  0xa9   : > { %406 = vadd.xlane.f32.xlu1 %v405_v59  ;;  %409 = vadd.xlane.f32.xlu0 %v408_v2  ;;  %v325_v3 = vpop.xlane.xlu0 %324  ;;  %v328_v4 = vpop.xlane.xlu1 %327  ;;  %v556_v59 = vld [vmem:[%s2084_s3 + $0x10] sm:$0xff]  ;;  %v1454_v62 = vmov 0.0   ;;  %v958_v2 = vld [vmem:[%s2086_s5 + $0x78] sm:$0xff] }
  0xaa   : > { %v356_v6 = vmul.f32 0.03125, %v325_v3  ;;  %v357_v7 = vmul.f32 0.03125, %v328_v4  ;;  %v386_v8 = vmul.f32 %v1604_v0, %v1604_v0  ;;  %v387_v9 = vmul.f32 %v1607_v1, %v1607_v1  ;;  %686 = vmatprep.mubr.f32.mxu0 %v1454_v62  ;;  %1309 = vmatprep.subr.mxu1 %v974_v63  ;;  %v1699_v3 = vld [vmem:[%s2086_s5 + $0xf0] sm:$0xff] }
  0xab   : > { %1325 = vmatpush3.msra.mxu1 %v958_v2  ;;  %v1704_v4 = vld [vmem:[%s2086_s5 + $0x70] sm:$0xff] }
  0xac   : > { %v1616_v10 = vsub.f32 %v1536_v16, %v356_v6  ;;  %v1619_v11 = vsub.f32 %v1539_v17, %v357_v7  ;;  %v414_v12 = vsel %vm298_vm0, %v386_v8, 0.0  ;;  %v417_v15 = vsel %vm298_vm0, %v387_v9, 0.0  ;;  %1310 = vmatprep.subr.mxu1 %v1699_v3  ;;  %v1716_v6 = vld [vmem:[%s2086_s5 + $0x68] sm:$0xff] }
  0xad   : > { %412 = vadd.xlane.f32.xlu1 %v411_v5  ;;  %415 = vadd.xlane.f32.xlu0 %v414_v12  ;;  %v331_v13 = vpop.xlane.xlu0 %330  ;;  %v334_v14 = vpop.xlane.xlu1 %333  ;;  %v1710_v5 = vld [vmem:[%s2086_s5 + $0xe8] sm:$0xff] }
  0xae   : > { %v358_v18 = vmul.f32 0.03125, %v331_v13  ;;  %v359_v19 = vmul.f32 0.03125, %v334_v14  ;;  %v388_v22 = vmul.f32 %v1616_v10, %v1616_v10  ;;  %v389_v16 = vmul.f32 %v1619_v11, %v1619_v11  ;;  %1326 = vmatpush3.msra.mxu1 %v1704_v4 }
  0xaf   : > { %1311 = vmatprep.subr.mxu1 %v1710_v5 }
  0xb0   : > { %v1628_v23 = vsub.f32 %v1546_v20, %v358_v18  ;;  %v1631_v17 = vsub.f32 %v1549_v21, %v359_v19  ;;  %v420_v26 = vsel %vm298_vm0, %v388_v22, 0.0  ;;  %v423_v31 = vsel %vm298_vm0, %v389_v16, 0.0  ;;  %1327 = vmatpush3.msra.mxu1 %v1716_v6 }
  0xb1   : > { %418 = vadd.xlane.f32.xlu1 %v417_v15  ;;  %421 = vadd.xlane.f32.xlu0 %v420_v26  ;;  %v337_v27 = vpop.xlane.xlu0 %336  ;;  %v340_v30 = vpop.xlane.xlu1 %339 }
  0xb2   : > { %v360_v32 = vmul.f32 0.03125, %v337_v27  ;;  %v361_v33 = vmul.f32 0.03125, %v340_v30  ;;  %v390_v34 = vmul.f32 %v1628_v23, %v1628_v23  ;;  %v391_v20 = vmul.f32 %v1631_v17, %v1631_v17 }
  0xb4   : > { %v1640_v35 = vsub.f32 %v1556_v24, %v360_v32  ;;  %v1643_v21 = vsub.f32 %v1559_v25, %v361_v33  ;;  %v426_v38 = vsel %vm298_vm0, %v390_v34, 0.0  ;;  %v429_v41 = vsel %vm298_vm0, %v391_v20, 0.0 }
  0xb5   : > { %424 = vadd.xlane.f32.xlu1 %v423_v31  ;;  %427 = vadd.xlane.f32.xlu0 %v426_v38  ;;  %v343_v39 = vpop.xlane.xlu0 %342  ;;  %v346_v40 = vpop.xlane.xlu1 %345 }
  0xb6   : > { %v362_v42 = vmul.f32 0.03125, %v343_v39  ;;  %v363_v43 = vmul.f32 0.03125, %v346_v40  ;;  %v392_v46 = vmul.f32 %v1640_v35, %v1640_v35  ;;  %v393_v24 = vmul.f32 %v1643_v21, %v1643_v21 }
  0xb8   : > { %v1652_v47 = vsub.f32 %v1566_v28, %v362_v42  ;;  %v1655_v25 = vsub.f32 %v1569_v29, %v363_v43  ;;  %v432_v48 = vsel %vm298_vm0, %v392_v46, 0.0  ;;  %v435_v49 = vsel %vm298_vm0, %v393_v24, 0.0  ;;  %v561_v28 = vld [vmem:[%s2084_s3 + $0x38] sm:$0xff]  ;;  %v560_v29 = vld [vmem:[%s2084_s3 + $0x30] sm:$0xff] }
  0xb9   : > { %430 = vadd.xlane.f32.xlu1 %v429_v41  ;;  %433 = vadd.xlane.f32.xlu0 %v432_v48  ;;  %v1723_v41 = vld [vmem:[%s2082_s1] ss:$0 sm:$0xff] }
  0xba   : > { %v394_v50 = vmul.f32 %v1652_v47, %v1652_v47  ;;  %v395_v51 = vmul.f32 %v1655_v25, %v1655_v25  ;;  %646 = vmatprep.subr.mxu0 %v561_v28  ;;  %v1729_v48 = vld [vmem:[%s2083_s2] ss:$0 sm:$0xff] }
  0xbb   : > { %647 = vmatpush1.msra.mxu0 %v560_v29 }
  0xbc   : > { %v438_v52 = vsel %vm298_vm0, %v394_v50, 0.0  ;;  %v441_v56 = vsel %vm298_vm0, %v395_v51, 0.0  ;;  %648 = vmatprep.subr.mxu0 %v559_v53 }
  0xbd   : > { %436 = vadd.xlane.f32.xlu1 %v435_v49  ;;  %439 = vadd.xlane.f32.xlu0 %v438_v52 }
  0xbe   : > { %649 = vmatpush1.msra.mxu0 %v558_v57 }
  0xbf   : > { %650 = vmatprep.subr.mxu0 %v557_v58 }
  0xc0   : > { %651 = vmatpush1.msra.mxu0 %v556_v59 }
  0xc1   : > { %442 = vadd.xlane.f32.xlu1 %v441_v56  ;;  %652 = vmatprep.subr.mxu0 %v555_v60 }
  0xc2   : > { %653 = vmatpush1.msra.mxu0 %v554_v61 }
  0xc3   : > { %1229 = vmatprep.subr.mxu0 %v974_v63 }
 0x12a   : > { %v398_v7 = vpop.xlane.xlu0 %397 }
 0x12b   : > { %v444_v8 = vmul.f32 0.03125, %v398_v7 }
 0x12d   : > { %v460_v9 = vadd.f32 1e-05, %v444_v8 }
 0x12e   : > { %v401_v12 = vpop.xlane.xlu1 %400  ;;  %v404_v13 = vpop.xlane.xlu0 %403 }
 0x12f   : > { %1350 = vrsqrt.f32 %v460_v9  ;;  %v445_v14 = vmul.f32 0.03125, %v401_v12  ;;  %v446_v15 = vmul.f32 0.03125, %v404_v13 }
 0x131   : > { %v461_v18 = vadd.f32 1e-05, %v445_v14  ;;  %v462_v19 = vadd.f32 1e-05, %v446_v15 }
 0x132   : > { %v407_v22 = vpop.xlane.xlu1 %406  ;;  %v410_v16 = vpop.xlane.xlu0 %409 }
 0x133   : > { %1352 = vrsqrt.f32 %v461_v18  ;;  %v447_v26 = vmul.f32 0.03125, %v407_v22  ;;  %v448_v27 = vmul.f32 0.03125, %v410_v16 }
 0x134   : > { %1354 = vrsqrt.f32 %v462_v19 }
 0x135   : > { %v463_v30 = vadd.f32 1e-05, %v447_v26  ;;  %v464_v31 = vadd.f32 1e-05, %v448_v27 }
 0x136   : > { %v413_v32 = vpop.xlane.xlu1 %412  ;;  %v416_v33 = vpop.xlane.xlu0 %415 }
 0x137   : > { %1356 = vrsqrt.f32 %v463_v30  ;;  %v449_v34 = vmul.f32 0.03125, %v413_v32  ;;  %v450_v38 = vmul.f32 0.03125, %v416_v33 }
 0x138   : > { %1358 = vrsqrt.f32 %v464_v31 }
 0x139   : > { %v465_v20 = vadd.f32 1e-05, %v449_v34  ;;  %v466_v42 = vadd.f32 1e-05, %v450_v38 }
 0x13a   : > { %v419_v39 = vpop.xlane.xlu1 %418  ;;  %v422_v46 = vpop.xlane.xlu0 %421 }
 0x13b   : > { %1360 = vrsqrt.f32 %v465_v20  ;;  %v451_v43 = vmul.f32 0.03125, %v419_v39  ;;  %v452_v51 = vmul.f32 0.03125, %v422_v46 }
 0x13c   : > { %v1351_v40 = vpop.eup %1350  ;;  %1362 = vrsqrt.f32 %v466_v42 }
 0x13d   : > { %v492_v24 = vmul.f32 %v1351_v40, %v1575_v36  ;;  %v467_v52 = vadd.f32 1e-05, %v451_v43  ;;  %v468_v59 = vadd.f32 1e-05, %v452_v51 }
 0x13e   : > { %v425_v29 = vpop.xlane.xlu1 %424  ;;  %v428_v61 = vpop.xlane.xlu0 %427 }
 0x13f   : > { %v515_v49 = vmul.f32 %v1723_v41, %v492_v24  ;;  %v453_v60 = vmul.f32 0.03125, %v425_v29  ;;  %1364 = vrsqrt.f32 %v467_v52  ;;  %v454_v9 = vmul.f32 0.03125, %v428_v61 }
 0x140   : > { %v1353_v50 = vpop.eup %1352  ;;  %1366 = vrsqrt.f32 %v468_v59 }
 0x141   : > { %v1355_v28 = vpop.eup %1354  ;;  %v538_v53 = vadd.f32 %v1729_v48, %v515_v49  ;;  %v493_v56 = vmul.f32 %v1353_v50, %v1583_v44  ;;  %v469_v8 = vadd.f32 1e-05, %v453_v60 }
 0x142   : > { %v494_v57 = vmul.f32 %v1355_v28, %v1577_v37  ;;  %v431_v13 = vpop.xlane.xlu1 %430  ;;  %v434_v14 = vpop.xlane.xlu0 %433 }
 0x143   : > { %1210 = vmatmul.mubr.msk.f32.vlgmr.msra.gmra.mxu0 %vm298_vm0, %v538_v53  ;;  %v516_v36 = vmul.f32 %v1723_v41, %v493_v56  ;;  %1368 = vrsqrt.f32 %v469_v8 }
 0x144   : > { %v1357_v58 = vpop.eup %1356  ;;  %692 = vmatprep.mubr.f32.mxu0 %v1454_v62  ;;  %1230 = vmatpush3.msra.mxu0 %v958_v2  ;;  %v517_v7 = vmul.f32 %v1723_v41, %v494_v57 }
 0x145   : > { %v539_v63 = vadd.f32 %v1729_v48, %v516_v36  ;;  %v495_v44 = vmul.f32 %v1357_v58, %v1585_v45  ;;  %1231 = vmatprep.subr.mxu0 %v1699_v3  ;;  %v1359_v37 = vpop.eup %1358 }
 0x146   : > { %1232 = vmatpush3.msra.mxu0 %v1704_v4  ;;  %v540_v2 = vadd.f32 %v1729_v48, %v517_v7  ;;  %v496_v3 = vmul.f32 %v1359_v37, %v1593_v54  ;;  %v470_v4 = vadd.f32 1e-05, %v454_v9  ;;  %v456_v54 = vmul.f32 0.03125, %v434_v14  ;;  %v437_v16 = vpop.xlane.xlu1 %436  ;;  %v440_v33 = vpop.xlane.xlu0 %439  ;;  %v953_v14 = vld [vmem:[%s2086_s5 + $0x50] sm:$0xff] }
 0x147   : > { %1211 = vmatmul.mubr.msk.f32.gmra.mxu0 %vm298_vm0, %v539_v63  ;;  %1233 = vmatprep.subr.mxu0 %v1710_v5  ;;  %v518_v45 = vmul.f32 %v1723_v41, %v495_v44  ;;  %v455_v5 = vmul.f32 0.03125, %v431_v13 }
 0x148   : > { %698 = vmatprep.mubr.f32.mxu0 %v1454_v62  ;;  %1234 = vmatpush3.msra.mxu0 %v1716_v6  ;;  %v1361_v12 = vpop.eup %1360  ;;  %v519_v6 = vmul.f32 %v1723_v41, %v496_v3  ;;  %1370 = vrsqrt.f32 %v470_v4  ;;  %v472_v32 = vadd.f32 1e-05, %v456_v54  ;;  %v966_v54 = vld [vmem:[%s2086_s5 + $0xb8] sm:$0xff] }
 0x149   : > { %v541_v15 = vadd.f32 %v1729_v48, %v518_v45  ;;  %v497_v18 = vmul.f32 %v1361_v12, %v1595_v55  ;;  %v1363_v19 = vpop.eup %1362  ;;  %v471_v22 = vadd.f32 1e-05, %v455_v5  ;;  %v457_v55 = vmul.f32 0.03125, %v437_v16  ;;  %v955_v5 = vld [vmem:[%s2086_s5 + $0x60] sm:$0xff]  ;;  %v965_v16 = vld [vmem:[%s2086_s5 + $0xb0] sm:$0xff] }
 0x14a   : > { %v542_v26 = vadd.f32 %v1729_v48, %v519_v6  ;;  %v498_v30 = vmul.f32 %v1363_v19, %v1604_v0  ;;  %v458_v0 = vmul.f32 0.03125, %v440_v33  ;;  %v443_v49 = vpop.xlane.xlu1 %442  ;;  %v952_v6 = vld [vmem:[%s2086_s5 + $0x48] sm:$0xff]  ;;  %v951_v19 = vld [vmem:[%s2086_s5 + $0x40] sm:$0xff]  ;;  %v946_v33 = vld [vmem:[%s2086_s5 + $0x18] sm:$0xff] }
 0x14b   : > { %1212 = vmatmul.mubr.msk.f32.gmra.mxu0 %vm298_vm0, %v540_v2  ;;  %v520_v27 = vmul.f32 %v1723_v41, %v497_v18  ;;  %1372 = vrsqrt.f32 %v471_v22  ;;  %v473_v40 = vadd.f32 1e-05, %v457_v55  ;;  %v459_v51 = vmul.f32 0.03125, %v443_v49  ;;  %v967_v18 = vld [vmem:[%s2086_s5 + $0xc0] sm:$0xff]  ;;  %v950_v22 = vld [vmem:[%s2086_s5 + $0x38] sm:$0xff] }
 0x14c   : > { %704 = vmatprep.mubr.f32.mxu0 %v1454_v62  ;;  %v1365_v31 = vpop.eup %1364  ;;  %v521_v20 = vmul.f32 %v1723_v41, %v498_v30  ;;  %1374 = vrsqrt.f32 %v472_v32  ;;  %v948_v30 = vld [vmem:[%s2086_s5 + $0x28] sm:$0xff]  ;;  %v947_v32 = vld [vmem:[%s2086_s5 + $0x20] sm:$0xff]  ;;  %v962_v55 = vld [vmem:[%s2086_s5 + $0x98] sm:$0xff] }
 0x14d   : > { %v543_v34 = vadd.f32 %v1729_v48, %v520_v27  ;;  %v499_v38 = vmul.f32 %v1365_v31, %v1607_v1  ;;  %v1367_v39 = vpop.eup %1366  ;;  %1376 = vrsqrt.f32 %v473_v40  ;;  %v474_v1 = vadd.f32 1e-05, %v458_v0  ;;  %v964_v27 = vld [vmem:[%s2086_s5 + $0xa8] sm:$0xff]  ;;  %v963_v31 = vld [vmem:[%s2086_s5 + $0xa0] sm:$0xff] }
 0x14e   : > { %v544_v43 = vadd.f32 %v1729_v48, %v521_v20  ;;  %v500_v24 = vmul.f32 %v1367_v39, %v1616_v10  ;;  %v475_v10 = vadd.f32 1e-05, %v459_v51  ;;  %v945_v20 = vld [vmem:[%s2086_s5 + $0x10] sm:$0xff]  ;;  %v944_v39 = vld [vmem:[%s2086_s5 + $0x8] sm:$0xff]  ;;  %v959_v40 = vld [vmem:[%s2086_s5 + $0x80] sm:$0xff] }
 0x14f   : > { %1213 = vmatmul.mubr.msk.f32.gmra.mxu0 %vm298_vm0, %v541_v15  ;;  %v522_v46 = vmul.f32 %v1723_v41, %v499_v38  ;;  %1378 = vrsqrt.f32 %v474_v1  ;;  %v968_v15 = vld [vmem:[%s2086_s5 + $0xc8] sm:$0xff]  ;;  %v943_v0 = vld [vmem:[%s2086_s5] sm:$0xff] }
 0x150   : > { %710 = vmatprep.mubr.f32.mxu0 %v1454_v62  ;;  %v1369_v42 = vpop.eup %1368  ;;  %v523_v52 = vmul.f32 %v1723_v41, %v500_v24  ;;  %1380 = vrsqrt.f32 %v475_v10  ;;  %v960_v38 = vld [vmem:[%s2086_s5 + $0x88] sm:$0xff]  ;;  %v562_v24 = vld [vmem:[%s2085_s4] sm:$0x3] }
 0x151   : > { %v545_v28 = vadd.f32 %v1729_v48, %v522_v46  ;;  %v501_v29 = vmul.f32 %v1369_v42, %v1619_v11  ;;  %v564_v42 = vlaneseq }
 0x152   : > { %v546_v53 = vadd.f32 %v1729_v48, %v523_v52 }
 0x153   : > { %1214 = vmatmul.mubr.msk.f32.gmra.mxu0 %vm298_vm0, %v542_v26  ;;  %v524_v56 = vmul.f32 %v1723_v41, %v501_v29  ;;  %v949_v26 = vld [vmem:[%s2086_s5 + $0x30] sm:$0xff] }
 0x154   : > { %716 = vmatprep.mubr.f32.mxu0 %v1454_v62 }
 0x155   : > { %v1371_v50 = vpop.eup %1370  ;;  %v547_v11 = vadd.f32 %v1729_v48, %v524_v56 }
 0x156   : > { %v502_v57 = vmul.f32 %v1371_v50, %v1628_v23 }
 0x157   : > { %1215 = vmatmul.mubr.msk.f32.gmra.mxu0 %vm298_vm0, %v543_v34  ;;  %v961_v34 = vld [vmem:[%s2086_s5 + $0x90] sm:$0xff] }
 0x158   : > { %722 = vmatprep.mubr.f32.mxu0 %v1454_v62  ;;  %v1373_v36 = vpop.eup %1372  ;;  %v525_v58 = vmul.f32 %v1723_v41, %v502_v57 }
 0x159   : > { %v503_v59 = vmul.f32 %v1373_v36, %v1631_v17  ;;  %v1375_v60 = vpop.eup %1374 }
 0x15a   : > { %v1377_v61 = vpop.eup %1376  ;;  %v548_v23 = vadd.f32 %v1729_v48, %v525_v58  ;;  %v504_v7 = vmul.f32 %v1375_v60, %v1640_v35 }
 0x15b   : > { %1216 = vmatmul.mubr.msk.f32.gmra.mxu0 %vm298_vm0, %v544_v43  ;;  %v526_v63 = vmul.f32 %v1723_v41, %v503_v59  ;;  %v505_v8 = vmul.f32 %v1377_v61, %v1643_v21  ;;  %v565_v43 = vshrl.u32 %v564_v42, 7 }
 0x15c   : > { %728 = vmatprep.mubr.f32.mxu0 %v1454_v62  ;;  %v1379_v44 = vpop.eup %1378  ;;  %v527_v17 = vmul.f32 %v1723_v41, %v504_v7 }
 0x15d   : > { %v549_v37 = vadd.f32 %v1729_v48, %v526_v63  ;;  %v528_v2 = vmul.f32 %v1723_v41, %v505_v8  ;;  %v506_v35 = vmul.f32 %v1379_v44, %v1652_v47  ;;  %v1381_v45 = vpop.eup %1380  ;;  %v566_v46 = vsub.s32 0, %v565_v43 }
 0x15e   : > { %v550_v9 = vadd.f32 %v1729_v48, %v527_v17  ;;  %v507_v21 = vmul.f32 %v1381_v45, %v1655_v25  ;;  %v971_v25 = vld [vmem:[%s2086_s5 + $0xe0] sm:$0xff]  ;;  %v570_v49 = vsub.s32 1, %v565_v43 }
 0x15f   : > { %1217 = vmatmul.mubr.msk.f32.gmra.mxu0 %vm298_vm0, %v545_v28  ;;  %v551_v3 = vadd.f32 %v1729_v48, %v528_v2  ;;  %v529_v12 = vmul.f32 %v1723_v41, %v506_v35  ;;  %1235 = vmatprep.subr.mxu0 %v971_v25  ;;  %v1894_v1 = vrot.slane %v562_v24, %v566_v46 }
 0x160   : > { %734 = vmatprep.mubr.f32.mxu0 %v1454_v62  ;;  %v530_v4 = vmul.f32 %v1723_v41, %v507_v21  ;;  %1312 = vmatprep.subr.mxu1 %v971_v25  ;;  %v970_v41 = vld [vmem:[%s2086_s5 + $0xd8] sm:$0xff]  ;;  %v1896_v50 = vrot.slane %v562_v24, %v570_v49 }
 0x161   : > { %v552_v13 = vadd.f32 %v1729_v48, %v529_v12  ;;  %1236 = vmatpush3.msra.mxu0 %v955_v5  ;;  %1328 = vmatpush3.msra.mxu1 %v955_v5 }
 0x162   : > { %v553_v47 = vadd.f32 %v1729_v48, %v530_v4  ;;  %1237 = vmatprep.subr.mxu0 %v970_v41  ;;  %1313 = vmatprep.subr.mxu1 %v970_v41  ;;  %v969_v48 = vld [vmem:[%s2086_s5 + $0xd0] sm:$0xff] }
 0x163   : > { %1218 = vmatmul.mubr.msk.f32.gmra.mxu0 %vm298_vm0, %v546_v53 }
 0x164   : > { %740 = vmatprep.mubr.f32.mxu0 %v1454_v62 }
 0x167   : > { %1219 = vmatmul.mubr.msk.f32.gmra.mxu0 %vm298_vm0, %v547_v11 }
 0x168   : > { %746 = vmatprep.mubr.f32.mxu0 %v1454_v62 }
 0x16b   : > { %1220 = vmatmul.mubr.msk.f32.gmra.mxu0 %vm298_vm0, %v548_v23 }
 0x16c   : > { %752 = vmatprep.mubr.f32.mxu0 %v1454_v62 }
 0x16f   : > { %1221 = vmatmul.mubr.msk.f32.gmra.mxu0 %vm298_vm0, %v549_v37 }
 0x170   : > { %758 = vmatprep.mubr.f32.mxu0 %v1454_v62 }
 0x173   : > { %1222 = vmatmul.mubr.msk.f32.gmra.mxu0 %vm298_vm0, %v550_v9 }
 0x174   : > { %764 = vmatprep.mubr.f32.mxu0 %v1454_v62 }
 0x177   : > { %1223 = vmatmul.mubr.msk.f32.gmra.mxu0 %vm298_vm0, %v551_v3 }
 0x178   : > { %770 = vmatprep.mubr.f32.mxu0 %v1454_v62 }
 0x17b   : > { %1224 = vmatmul.mubr.msk.f32.gmra.mxu0 %vm298_vm0, %v552_v13 }
 0x17c   : > { %776 = vmatprep.mubr.f32.mxu0 %v1454_v62  ;;  %v954_v62 = vld [vmem:[%s2086_s5 + $0x58] sm:$0xff] }
 0x17d   : > { %1238 = vmatpush3.msra.mxu0 %v954_v62  ;;  %1329 = vmatpush3.msra.mxu1 %v954_v62 }
 0x17e   : > { %1239 = vmatprep.subr.mxu0 %v969_v48  ;;  %1314 = vmatprep.subr.mxu1 %v969_v48 }
 0x17f   : > { %1225 = vmatmul.mubr.msk.f32.gmra.mxu0 %vm298_vm0, %v553_v47  ;;  %1330 = vmatpush3.msra.mxu1 %v953_v14 }
 0x180   : > { %1240 = vmatpush3.msra.mxu0 %v953_v14  ;;  %1315 = vmatprep.subr.mxu1 %v968_v15 }
 0x181   : > { %1241 = vmatprep.subr.mxu0 %v968_v15  ;;  %1331 = vmatpush3.msra.mxu1 %v952_v6 }
 0x182   : > { %1242 = vmatpush3.msra.mxu0 %v952_v6  ;;  %1316 = vmatprep.subr.mxu1 %v967_v18 }
 0x183   : > { %1243 = vmatprep.subr.mxu0 %v967_v18  ;;  %1332 = vmatpush3.msra.mxu1 %v951_v19 }
 0x184   : > { %1244 = vmatpush3.msra.mxu0 %v951_v19  ;;  %1317 = vmatprep.subr.mxu1 %v966_v54 }
 0x185   : > { %1245 = vmatprep.subr.mxu0 %v966_v54  ;;  %1333 = vmatpush3.msra.mxu1 %v950_v22 }
 0x186   : > { %1246 = vmatpush3.msra.mxu0 %v950_v22  ;;  %1318 = vmatprep.subr.mxu1 %v965_v16 }
 0x187   : > { %1247 = vmatprep.subr.mxu0 %v965_v16  ;;  %1334 = vmatpush3.msra.mxu1 %v949_v26 }
 0x188   : > { %1248 = vmatpush3.msra.mxu0 %v949_v26  ;;  %1319 = vmatprep.subr.mxu1 %v964_v27 }
 0x189   : > { %1249 = vmatprep.subr.mxu0 %v964_v27  ;;  %1335 = vmatpush3.msra.mxu1 %v948_v30 }
 0x18a   : > { %1250 = vmatpush3.msra.mxu0 %v948_v30  ;;  %1320 = vmatprep.subr.mxu1 %v963_v31 }
 0x18b   : > { %1251 = vmatprep.subr.mxu0 %v963_v31  ;;  %1336 = vmatpush3.msra.mxu1 %v947_v32 }
 0x18c   : > { %1252 = vmatpush3.msra.mxu0 %v947_v32  ;;  %1321 = vmatprep.subr.mxu1 %v962_v55 }
 0x18d   : > { %1253 = vmatprep.subr.mxu0 %v962_v55  ;;  %1337 = vmatpush3.msra.mxu1 %v946_v33 }
 0x18e   : > { %1254 = vmatpush3.msra.mxu0 %v946_v33  ;;  %1322 = vmatprep.subr.mxu1 %v961_v34 }
 0x18f   : > { %1255 = vmatprep.subr.mxu0 %v961_v34  ;;  %1338 = vmatpush3.msra.mxu1 %v945_v20 }
 0x190   : > { %1256 = vmatpush3.msra.mxu0 %v945_v20  ;;  %1323 = vmatprep.subr.mxu1 %v960_v38 }
 0x191   : > { %1257 = vmatprep.subr.mxu0 %v960_v38  ;;  %1339 = vmatpush3.msra.mxu1 %v944_v39 }
 0x192   : > { %1258 = vmatpush3.msra.mxu0 %v944_v39  ;;  %1324 = vmatprep.subr.mxu1 %v959_v40 }
 0x193   : > { %1259 = vmatprep.subr.mxu0 %v959_v40  ;;  %1340 = vmatpush3.msra.mxu1 %v943_v0 }
 0x194   : > { %1260 = vmatpush3.msra.mxu0 %v943_v0 }
 0x203   : > { %v688_v51 = vpop.f32.mrf.mxu0 }
 0x204   : > { %v689_v28 = vadd.f32 %v688_v51, %v1894_v1 }
 0x205   : > { %v690_v52 = vpop.f32.mrf.mxu0 }
 0x206   : > { %v815_v29 = vmul.f32 0.70710677, %v689_v28  ;;  %v691_v10 = vadd.f32 %v690_v52, %v1896_v50  ;;  %v783_v15 = vmul.f32 0.5, %v689_v28 }
 0x207   : > { %v694_v53 = vpop.f32.mrf.mxu0 }
 0x208   : > { %1382 = verf.f32 %v815_v29  ;;  %v816_v56 = vmul.f32 0.70710677, %v691_v10  ;;  %v695_v57 = vadd.f32 %v694_v53, %v1894_v1  ;;  %v784_v41 = vmul.f32 0.5, %v691_v10 }
 0x209   : > { %v696_v36 = vpop.f32.mrf.mxu0 }
 0x20a   : > { %1384 = verf.f32 %v816_v56  ;;  %v817_v11 = vmul.f32 0.70710677, %v695_v57  ;;  %v697_v58 = vadd.f32 %v696_v36, %v1896_v50  ;;  %v785_v38 = vmul.f32 0.5, %v695_v57 }
 0x20b   : > { %v700_v59 = vpop.f32.mrf.mxu0 }
 0x20c   : > { %1386 = verf.f32 %v817_v11  ;;  %v818_v60 = vmul.f32 0.70710677, %v697_v58  ;;  %v701_v61 = vadd.f32 %v700_v59, %v1894_v1  ;;  %v786_v33 = vmul.f32 0.5, %v697_v58 }
 0x20d   : > { %v702_v23 = vpop.f32.mrf.mxu0 }
 0x20e   : > { %1388 = verf.f32 %v818_v60  ;;  %v819_v63 = vmul.f32 0.70710677, %v701_v61  ;;  %v703_v7 = vadd.f32 %v702_v23, %v1896_v50  ;;  %v787_v52 = vmul.f32 0.5, %v701_v61 }
 0x20f   : > { %v706_v44 = vpop.f32.mrf.mxu0 }
 0x210   : > { %1390 = verf.f32 %v819_v63  ;;  %v820_v37 = vmul.f32 0.70710677, %v703_v7  ;;  %v1905_v17 = vadd.f32 %v706_v44, %v1894_v1  ;;  %v788_v29 = vmul.f32 0.5, %v703_v7 }
 0x211   : > { %v708_v8 = vpop.f32.mrf.mxu0 }
 0x212   : > { %1392 = verf.f32 %v820_v37  ;;  %v821_v9 = vmul.f32 0.70710677, %v1905_v17  ;;  %v1909_v2 = vadd.f32 %v708_v8, %v1896_v50  ;;  %v789_v8 = vmul.f32 0.5, %v1905_v17 }
 0x213   : > { %v712_v35 = vpop.f32.mrf.mxu0 }
 0x214   : > { %1394 = verf.f32 %v821_v9  ;;  %v822_v45 = vmul.f32 0.70710677, %v1909_v2  ;;  %v1913_v3 = vadd.f32 %v712_v35, %v1894_v1  ;;  %v790_v44 = vmul.f32 0.5, %v1909_v2 }
 0x215   : > { %v1383_v12 = vpop.eup %1382  ;;  %v714_v21 = vpop.f32.mrf.mxu0 }
 0x216   : > { %1396 = verf.f32 %v822_v45  ;;  %v823_v13 = vmul.f32 0.70710677, %v1913_v3  ;;  %v879_v47 = vadd.f32 1.0, %v1383_v12  ;;  %v1917_v25 = vadd.f32 %v714_v21, %v1896_v50 }
 0x217   : > { %v1385_v4 = vpop.eup %1384  ;;  %v718_v5 = vpop.f32.mrf.mxu0  ;;  %v791_v17 = vmul.f32 0.5, %v1913_v3 }
 0x218   : > { %1398 = verf.f32 %v823_v13  ;;  %v1920_v62 = vadd.f32 %v718_v5, %v1894_v1  ;;  %v880_v48 = vadd.f32 1.0, %v1385_v4  ;;  %v824_v6 = vmul.f32 0.70710677, %v1917_v25 }
 0x219   : > { %v1387_v14 = vpop.eup %1386  ;;  %v720_v18 = vpop.f32.mrf.mxu0  ;;  %v911_v26 = vmul.f32 %v879_v47, %v783_v15 }
 0x21a   : > { %v825_v19 = vmul.f32 0.70710677, %v1920_v62  ;;  %v1925_v54 = vadd.f32 %v720_v18, %v1896_v50  ;;  %v912_v22 = vmul.f32 %v880_v48, %v784_v41  ;;  %1400 = verf.f32 %v824_v6 }
 0x21b   : > { %v1389_v16 = vpop.eup %1388  ;;  %v724_v27 = vpop.f32.mrf.mxu0  ;;  %v881_v32 = vadd.f32 1.0, %v1387_v14  ;;  %v792_v41 = vmul.f32 0.5, %v1917_v25 }
 0x21c   : > { %1402 = verf.f32 %v825_v19  ;;  %v826_v30 = vmul.f32 0.70710677, %v1925_v54  ;;  %v1929_v31 = vadd.f32 %v724_v27, %v1894_v1  ;;  %1046 = vmatprep.mubr.f32.mxu0 %v912_v22  ;;  %v882_v20 = vadd.f32 1.0, %v1389_v16 }
 0x21d   : > { %v1391_v55 = vpop.eup %1390  ;;  %v726_v34 = vpop.f32.mrf.mxu0  ;;  %1047 = vmatmul.mubr.f32.vlgmr.msra.gmra.mxu0 %v911_v26  ;;  %v913_v51 = vmul.f32 %v881_v32, %v785_v38 }
 0x21e   : > { %1404 = verf.f32 %v826_v30  ;;  %v827_v39 = vmul.f32 0.70710677, %v1929_v31  ;;  %v1933_v40 = vadd.f32 %v726_v34, %v1896_v50  ;;  %v914_v43 = vmul.f32 %v882_v20, %v786_v33 }
 0x21f   : > { %v1393_v0 = vpop.eup %1392  ;;  %v730_v42 = vpop.f32.mrf.mxu0  ;;  %v883_v46 = vadd.f32 1.0, %v1391_v55  ;;  %v794_v30 = vmul.f32 0.5, %v1925_v54  ;;  %v793_v33 = vmul.f32 0.5, %v1920_v62  ;;  %v795_v62 = vmul.f32 0.5, %v1929_v31 }
 0x220   : > { %1406 = verf.f32 %v827_v39  ;;  %v828_v24 = vmul.f32 0.70710677, %v1933_v40  ;;  %v1937_v49 = vadd.f32 %v730_v42, %v1894_v1  ;;  %1051 = vmatprep.mubr.f32.mxu0 %v914_v43  ;;  %v884_v53 = vadd.f32 1.0, %v1393_v0 }
 0x221   : > { %v1395_v28 = vpop.eup %1394  ;;  %v732_v10 = vpop.f32.mrf.mxu0  ;;  %1052 = vmatmul.mubr.f32.gmra.mxu0 %v913_v51  ;;  %v915_v59 = vmul.f32 %v883_v46, %v787_v52  ;;  %v796_v51 = vmul.f32 0.5, %v1933_v40 }
 0x222   : > { %1408 = verf.f32 %v828_v24  ;;  %v829_v56 = vmul.f32 0.70710677, %v1937_v49  ;;  %v1941_v57 = vadd.f32 %v732_v10, %v1896_v50  ;;  %v916_v58 = vmul.f32 %v884_v53, %v788_v29 }
 0x223   : > { %v1397_v36 = vpop.eup %1396  ;;  %v736_v11 = vpop.f32.mrf.mxu0  ;;  %v885_v23 = vadd.f32 1.0, %v1395_v28 }
 0x224   : > { %1410 = verf.f32 %v829_v56  ;;  %v830_v60 = vmul.f32 0.70710677, %v1941_v57  ;;  %v1945_v61 = vadd.f32 %v736_v11, %v1894_v1  ;;  %1056 = vmatprep.mubr.f32.mxu0 %v916_v58  ;;  %v886_v37 = vadd.f32 1.0, %v1397_v36 }
 0x225   : > { %v1399_v63 = vpop.eup %1398  ;;  %v738_v7 = vpop.f32.mrf.mxu0  ;;  %1057 = vmatmul.mubr.f32.gmra.mxu0 %v915_v59  ;;  %v917_v2 = vmul.f32 %v885_v23, %v789_v8 }
 0x226   : > { %1412 = verf.f32 %v830_v60  ;;  %v831_v9 = vmul.f32 0.70710677, %v1945_v61  ;;  %v1951_v35 = vadd.f32 %v738_v7, %v1896_v50  ;;  %v918_v12 = vmul.f32 %v886_v37, %v790_v44 }
 0x227   : > { %v742_v45 = vpop.f32.mrf.mxu0  ;;  %v887_v21 = vadd.f32 1.0, %v1399_v63  ;;  %v1401_v13 = vpop.eup %1400  ;;  %v798_v60 = vmul.f32 0.5, %v1941_v57  ;;  %v797_v7 = vmul.f32 0.5, %v1937_v49  ;;  %v799_v49 = vmul.f32 0.5, %v1945_v61 }
 0x228   : > { %1414 = verf.f32 %v831_v9  ;;  %v832_v4 = vmul.f32 0.70710677, %v1951_v35  ;;  %v1955_v47 = vadd.f32 %v742_v45, %v1894_v1  ;;  %1061 = vmatprep.mubr.f32.mxu1 %v918_v12  ;;  %v888_v14 = vadd.f32 1.0, %v1401_v13 }
 0x229   : > { %v1403_v5 = vpop.eup %1402  ;;  %v744_v48 = vpop.f32.mrf.mxu0  ;;  %1062 = vmatmul.mubr.f32.vlgmr.msra.gmra.mxu1 %v917_v2  ;;  %v919_v16 = vmul.f32 %v887_v21, %v791_v17  ;;  %v800_v2 = vmul.f32 0.5, %v1951_v35 }
 0x22a   : > { %1416 = verf.f32 %v832_v4  ;;  %v833_v15 = vmul.f32 0.70710677, %v1955_v47  ;;  %v1961_v6 = vadd.f32 %v744_v48, %v1896_v50  ;;  %v920_v22 = vmul.f32 %v888_v14, %v792_v41 }
 0x22b   : > { %v1405_v18 = vpop.eup %1404  ;;  %v748_v19 = vpop.f32.mrf.mxu0  ;;  %v889_v25 = vadd.f32 1.0, %v1403_v5 }
 0x22c   : > { %1418 = verf.f32 %v833_v15  ;;  %v834_v26 = vmul.f32 0.70710677, %v1961_v6  ;;  %v1965_v3 = vadd.f32 %v748_v19, %v1894_v1  ;;  %1066 = vmatprep.mubr.f32.mxu1 %v920_v22  ;;  %v890_v55 = vadd.f32 1.0, %v1405_v18 }
 0x22d   : > { %v1407_v27 = vpop.eup %1406  ;;  %v750_v32 = vpop.f32.mrf.mxu0  ;;  %1067 = vmatmul.mubr.f32.gmra.mxu1 %v919_v16  ;;  %v921_v46 = vmul.f32 %v889_v25, %v793_v33 }
 0x22e   : > { %1420 = verf.f32 %v834_v26  ;;  %v835_v34 = vmul.f32 0.70710677, %v1965_v3  ;;  %v1971_v20 = vadd.f32 %v750_v32, %v1896_v50  ;;  %v922_v0 = vmul.f32 %v890_v55, %v794_v30 }
 0x22f   : > { %v1409_v38 = vpop.eup %1408  ;;  %v754_v39 = vpop.f32.mrf.mxu0  ;;  %v891_v42 = vadd.f32 1.0, %v1407_v27  ;;  %v802_v26 = vmul.f32 0.5, %v1961_v6  ;;  %v801_v30 = vmul.f32 0.5, %v1955_v47 }
 0x230   : > { %1422 = verf.f32 %v835_v34  ;;  %v836_v43 = vmul.f32 0.70710677, %v1971_v20  ;;  %v1975_v54 = vadd.f32 %v754_v39, %v1894_v1  ;;  %1071 = vmatprep.mubr.f32.mxu1 %v922_v0  ;;  %v892_v52 = vadd.f32 1.0, %v1409_v38 }
 0x231   : > { %v1411_v24 = vpop.eup %1410  ;;  %v756_v28 = vpop.f32.mrf.mxu0  ;;  %1072 = vmatmul.mubr.f32.gmra.mxu1 %v921_v46  ;;  %v923_v11 = vmul.f32 %v891_v42, %v795_v62  ;;  %v803_v46 = vmul.f32 0.5, %v1965_v3  ;;  %v804_v47 = vmul.f32 0.5, %v1971_v20 }
 0x232   : > { %1424 = verf.f32 %v836_v43  ;;  %v837_v29 = vmul.f32 0.70710677, %v1975_v54  ;;  %v1981_v10 = vadd.f32 %v756_v28, %v1896_v50  ;;  %v924_v36 = vmul.f32 %v892_v52, %v796_v51 }
 0x233   : > { %v1413_v53 = vpop.eup %1412  ;;  %v760_v56 = vpop.f32.mrf.mxu0  ;;  %v893_v40 = vadd.f32 1.0, %v1411_v24  ;;  %v805_v20 = vmul.f32 0.5, %v1975_v54 }
 0x234   : > { %1426 = verf.f32 %v837_v29  ;;  %v838_v58 = vmul.f32 0.70710677, %v1981_v10  ;;  %v1985_v31 = vadd.f32 %v760_v56, %v1894_v1  ;;  %1076 = vmatprep.mubr.f32.mxu1 %v924_v36  ;;  %v894_v63 = vadd.f32 1.0, %v1413_v53 }
 0x235   : > { %v1415_v59 = vpop.eup %1414  ;;  %v762_v23 = vpop.f32.mrf.mxu0  ;;  %1077 = vmatmul.mubr.f32.gmra.mxu1 %v923_v11  ;;  %v925_v13 = vmul.f32 %v893_v40, %v797_v7  ;;  %v806_v29 = vmul.f32 0.5, %v1981_v10 }
 0x236   : > { %1428 = verf.f32 %v838_v58  ;;  %v839_v44 = vmul.f32 0.70710677, %v1985_v31  ;;  %v1991_v37 = vadd.f32 %v762_v23, %v1896_v50  ;;  %v926_v45 = vmul.f32 %v894_v63, %v798_v60 }
 0x237   : > { %v1417_v8 = vpop.eup %1416  ;;  %v766_v9 = vpop.f32.mrf.mxu0  ;;  %v895_v12 = vadd.f32 1.0, %v1415_v59  ;;  %v807_v63 = vmul.f32 0.5, %v1985_v31 }
 0x238   : > { %1430 = verf.f32 %v839_v44  ;;  %v840_v21 = vmul.f32 0.70710677, %v1991_v37  ;;  %v1995_v57 = vadd.f32 %v766_v9, %v1894_v1  ;;  %1081 = vmatprep.mubr.f32.mxu1 %v926_v45  ;;  %v896_v17 = vadd.f32 1.0, %v1417_v8 }
 0x239   : > { %v1419_v4 = vpop.eup %1418  ;;  %v768_v5 = vpop.f32.mrf.mxu0  ;;  %1082 = vmatmul.mubr.f32.gmra.mxu1 %v925_v13  ;;  %v927_v19 = vmul.f32 %v895_v12, %v799_v49 }
 0x23a   : > { %1432 = verf.f32 %v840_v21  ;;  %v841_v41 = vmul.f32 0.70710677, %v1995_v57  ;;  %v769_v48 = vadd.f32 %v768_v5, %v1896_v50  ;;  %v928_v18 = vmul.f32 %v896_v17, %v800_v2 }
 0x23b   : > { %v1421_v14 = vpop.eup %1420  ;;  %v772_v15 = vpop.f32.mrf.mxu0  ;;  %v897_v61 = vadd.f32 1.0, %v1419_v4  ;;  %v809_v21 = vmul.f32 0.5, %v1995_v57 }
 0x23c   : > { %1434 = verf.f32 %v841_v41  ;;  %v842_v22 = vmul.f32 0.70710677, %v769_v48  ;;  %v2002_v16 = vadd.f32 %v772_v15, %v1894_v1  ;;  %1086 = vmatprep.mubr.f32.mxu1 %v928_v18  ;;  %v898_v27 = vadd.f32 1.0, %v1421_v14 }
 0x23d   : > { %v1423_v35 = vpop.eup %1422  ;;  %v774_v25 = vpop.f32.mrf.mxu0  ;;  %1087 = vmatmul.mubr.f32.gmra.mxu1 %v927_v19  ;;  %v929_v6 = vmul.f32 %v897_v61, %v801_v30  ;;  %v810_v8 = vmul.f32 0.5, %v769_v48 }
 0x23e   : > { %1436 = verf.f32 %v842_v22  ;;  %v843_v32 = vmul.f32 0.70710677, %v2002_v16  ;;  %v775_v55 = vadd.f32 %v774_v25, %v1896_v50  ;;  %v930_v38 = vmul.f32 %v898_v27, %v802_v26 }
 0x23f   : > { %v1425_v33 = vpop.eup %1424  ;;  %v778_v34 = vpop.f32.mrf.mxu0  ;;  %v899_v39 = vadd.f32 1.0, %v1423_v35  ;;  %v811_v17 = vmul.f32 0.5, %v2002_v16  ;;  %v2021_v16 = vld [vmem:[%s2087_s6] ss:$0 sm:$0xff] }
 0x240   : > { %1438 = verf.f32 %v843_v32  ;;  %v844_v0 = vmul.f32 0.70710677, %v775_v55  ;;  %v779_v42 = vadd.f32 %v778_v34, %v1894_v1  ;;  %1091 = vmatprep.mubr.f32.mxu1 %v930_v38  ;;  %v900_v62 = vadd.f32 1.0, %v1425_v33 }
 0x241   : > { %v1427_v43 = vpop.eup %1426  ;;  %v780_v24 = vpop.f32.mrf.mxu0  ;;  %1092 = vmatmul.mubr.f32.gmra.mxu1 %v929_v6  ;;  %v931_v56 = vmul.f32 %v899_v39, %v803_v46  ;;  %v812_v4 = vmul.f32 0.5, %v775_v55 }
 0x242   : > { %1440 = verf.f32 %v844_v0  ;;  %v845_v51 = vmul.f32 0.70710677, %v779_v42  ;;  %v781_v28 = vadd.f32 %v780_v24, %v1896_v50  ;;  %v932_v53 = vmul.f32 %v900_v62, %v804_v47 }
 0x243   : > { %v1429_v52 = vpop.eup %1428  ;;  %v901_v11 = vadd.f32 1.0, %v1427_v43  ;;  %v808_v50 = vmul.f32 0.5, %v1991_v37  ;;  %v813_v19 = vmul.f32 0.5, %v779_v42 }
 0x244   : > { %1442 = verf.f32 %v845_v51  ;;  %v846_v1 = vmul.f32 0.70710677, %v781_v28  ;;  %v902_v36 = vadd.f32 1.0, %v1429_v52  ;;  %1096 = vmatprep.mubr.f32.mxu1 %v932_v53  ;;  %v814_v14 = vmul.f32 0.5, %v781_v28 }
 0x245   : > { %v1431_v3 = vpop.eup %1430  ;;  %1097 = vmatmul.mubr.f32.gmra.mxu1 %v931_v56  ;;  %v933_v59 = vmul.f32 %v901_v11, %v805_v20 }
 0x246   : > { %1444 = verf.f32 %v846_v1  ;;  %v934_v58 = vmul.f32 %v902_v36, %v806_v29  ;;  %v903_v10 = vadd.f32 1.0, %v1431_v3 }
 0x247   : > { %v1433_v40 = vpop.eup %1432 }
 0x248   : > { %1101 = vmatprep.mubr.f32.mxu1 %v934_v58  ;;  %v904_v60 = vadd.f32 1.0, %v1433_v40  ;;  %v935_v9 = vmul.f32 %v903_v10, %v807_v63 }
 0x249   : > { %v1435_v23 = vpop.eup %1434  ;;  %1102 = vmatmul.mubr.f32.gmra.mxu1 %v933_v59 }
 0x24a   : > { %v936_v7 = vmul.f32 %v904_v60, %v808_v50  ;;  %v905_v45 = vadd.f32 1.0, %v1435_v23 }
 0x24b   : > { %v1437_v44 = vpop.eup %1436 }
 0x24c   : > { %1106 = vmatprep.mubr.f32.mxu1 %v936_v7  ;;  %v906_v54 = vadd.f32 1.0, %v1437_v44  ;;  %v937_v49 = vmul.f32 %v905_v45, %v809_v21 }
 0x24d   : > { %v1439_v12 = vpop.eup %1438  ;;  %1107 = vmatmul.mubr.f32.gmra.mxu1 %v935_v9 }
 0x24e   : > { %v938_v37 = vmul.f32 %v906_v54, %v810_v8  ;;  %v907_v5 = vadd.f32 1.0, %v1439_v12 }
 0x24f   : > { %v1441_v13 = vpop.eup %1440 }
 0x250   : > { %1111 = vmatprep.mubr.f32.mxu1 %v938_v37  ;;  %v908_v2 = vadd.f32 1.0, %v1441_v13  ;;  %v939_v15 = vmul.f32 %v907_v5, %v811_v17 }
 0x251   : > { %v1443_v31 = vpop.eup %1442  ;;  %1112 = vmatmul.mubr.f32.gmra.mxu1 %v937_v49 }
 0x252   : > { %v940_v41 = vmul.f32 %v908_v2, %v812_v4  ;;  %v909_v57 = vadd.f32 1.0, %v1443_v31 }
 0x253   : > { %v1445_v48 = vpop.eup %1444 }
 0x254   : > { %1116 = vmatprep.mubr.f32.mxu1 %v940_v41  ;;  %v910_v18 = vadd.f32 1.0, %v1445_v48  ;;  %v941_v61 = vmul.f32 %v909_v57, %v813_v19 }
 0x255   : > { %1117 = vmatmul.mubr.f32.gmra.mxu1 %v939_v15 }
 0x256   : > { %v942_v22 = vmul.f32 %v910_v18, %v814_v14 }
 0x258   : > { %1121 = vmatprep.mubr.f32.mxu1 %v942_v22 }
 0x259   : > { %1122 = vmatmul.mubr.f32.gmra.mxu1 %v941_v61 }
 0x2dd   : > { %v1261_v35 = vpop.f32.mrf.mxu0 }
 0x2df   : > { %v1262_v26 = vpop.f32.mrf.mxu0 }
 0x2e0   : > { %v1263_v25 = vadd.f32 %v1262_v26, %v1261_v35 }
 0x2e1   : > { %v1264_v30 = vpop.f32.mrf.mxu0 }
 0x2e2   : > { %v1049_v27 = vadd.f32 %v1263_v25, %v2021_v16 }
 0x2e3   : > { %v1265_v32 = vpop.f32.mrf.mxu0 }
 0x2e4   : > { %1127 = vst.msk [vmem:[%s2028_s18] sm:$0xff] %vm298_vm0, %v1049_v27  ;;  %v1266_v55 = vadd.f32 %v1265_v32, %v1264_v30 }
 0x2e5   : > { %v1267_v33 = vpop.f32.mrf.mxu0 }
 0x2e6   : > { %v1054_v34 = vadd.f32 %v1266_v55, %v2021_v16 }
 0x2e7   : > { %v1268_v38 = vpop.f32.mrf.mxu0 }
 0x2e8   : > { %1128 = vst.msk [vmem:[%s2028_s18 + $0x8] sm:$0xff] %vm298_vm0, %v1054_v34  ;;  %v1269_v39 = vadd.f32 %v1268_v38, %v1267_v33 }
 0x2e9   : > { %v1270_v0 = vpop.f32.mrf.mxu1 }
 0x2ea   : > { %v1059_v42 = vadd.f32 %v1269_v39, %v2021_v16 }
 0x2eb   : > { %v1271_v6 = vpop.f32.mrf.mxu1 }
 0x2ec   : > { %1129 = vst.msk [vmem:[%s2028_s18 + $0x10] sm:$0xff] %vm298_vm0, %v1059_v42  ;;  %v1272_v43 = vadd.f32 %v1271_v6, %v1270_v0 }
 0x2ed   : > { %v1273_v46 = vpop.f32.mrf.mxu1 }
 0x2ee   : > { %v1064_v47 = vadd.f32 %v1272_v43, %v2021_v16 }
 0x2ef   : > { %v1274_v24 = vpop.f32.mrf.mxu1 }
 0x2f0   : > { %1130 = vst.msk [vmem:[%s2028_s18 + $0x18] sm:$0xff] %vm298_vm0, %v1064_v47  ;;  %v1275_v62 = vadd.f32 %v1274_v24, %v1273_v46 }
 0x2f1   : > { %v1276_v51 = vpop.f32.mrf.mxu1 }
 0x2f2   : > { %v1069_v28 = vadd.f32 %v1275_v62, %v2021_v16 }
 0x2f3   : > { %v1277_v52 = vpop.f32.mrf.mxu1 }
 0x2f4   : > { %1131 = vst.msk [vmem:[%s2028_s18 + $0x20] sm:$0xff] %vm298_vm0, %v1069_v28  ;;  %v1278_v29 = vadd.f32 %v1277_v52, %v1276_v51 }
 0x2f5   : > { %v1279_v53 = vpop.f32.mrf.mxu1 }
 0x2f6   : > { %v1074_v56 = vadd.f32 %v1278_v29, %v2021_v16 }
 0x2f7   : > { %v1280_v1 = vpop.f32.mrf.mxu1 }
 0x2f8   : > { %1132 = vst.msk [vmem:[%s2028_s18 + $0x28] sm:$0xff] %vm298_vm0, %v1074_v56  ;;  %v1281_v36 = vadd.f32 %v1280_v1, %v1279_v53 }
 0x2f9   : > { %v1282_v11 = vpop.f32.mrf.mxu1 }
 0x2fa   : > { %v1079_v3 = vadd.f32 %v1281_v36, %v2021_v16 }
 0x2fb   : > { %v1283_v20 = vpop.f32.mrf.mxu1 }
 0x2fc   : > { %1133 = vst.msk [vmem:[%s2028_s18 + $0x30] sm:$0xff] %vm298_vm0, %v1079_v3  ;;  %v1284_v58 = vadd.f32 %v1283_v20, %v1282_v11 }
 0x2fd   : > { %v1285_v40 = vpop.f32.mrf.mxu1 }
 0x2fe   : > { %v1084_v50 = vadd.f32 %v1284_v58, %v2021_v16 }
 0x2ff   : > { %v1286_v59 = vpop.f32.mrf.mxu1 }
 0x300   : > { %1134 = vst.msk [vmem:[%s2028_s18 + $0x38] sm:$0xff] %vm298_vm0, %v1084_v50  ;;  %v1287_v60 = vadd.f32 %v1286_v59, %v1285_v40 }
 0x301   : > { %v1288_v10 = vpop.f32.mrf.mxu1 }
 0x302   : > { %v1089_v23 = vadd.f32 %v1287_v60, %v2021_v16 }
 0x303   : > { %v1289_v63 = vpop.f32.mrf.mxu1 }
 0x304   : > { %1135 = vst.msk [vmem:[%s2028_s18 + $0x40] sm:$0xff] %vm298_vm0, %v1089_v23  ;;  %v1290_v7 = vadd.f32 %v1289_v63, %v1288_v10 }
 0x305   : > { %v1291_v44 = vpop.f32.mrf.mxu1 }
 0x306   : > { %v1094_v8 = vadd.f32 %v1290_v7, %v2021_v16 }
 0x307   : > { %v1292_v9 = vpop.f32.mrf.mxu1 }
 0x308   : > { %1136 = vst.msk [vmem:[%s2028_s18 + $0x48] sm:$0xff] %vm298_vm0, %v1094_v8  ;;  %v1293_v54 = vadd.f32 %v1292_v9, %v1291_v44 }
 0x309   : > { %v1294_v45 = vpop.f32.mrf.mxu1 }
 0x30a   : > { %v1099_v12 = vadd.f32 %v1293_v54, %v2021_v16 }
 0x30b   : > { %v1295_v21 = vpop.f32.mrf.mxu1 }
 0x30c   : > { %1137 = vst.msk [vmem:[%s2028_s18 + $0x50] sm:$0xff] %vm298_vm0, %v1099_v12  ;;  %v1296_v37 = vadd.f32 %v1295_v21, %v1294_v45 }
 0x30d   : > { %v1297_v13 = vpop.f32.mrf.mxu1 }
 0x30e   : > { %v1104_v4 = vadd.f32 %v1296_v37, %v2021_v16 }
 0x30f   : > { %v1298_v49 = vpop.f32.mrf.mxu1 }
 0x310   : > { %1138 = vst.msk [vmem:[%s2028_s18 + $0x58] sm:$0xff] %vm298_vm0, %v1104_v4  ;;  %v1299_v2 = vadd.f32 %v1298_v49, %v1297_v13 }
 0x311   : > { %v1300_v5 = vpop.f32.mrf.mxu1 }
 0x312   : > { %v1109_v31 = vadd.f32 %v1299_v2, %v2021_v16 }
 0x313   : > { %v1301_v17 = vpop.f32.mrf.mxu1 }
 0x314   : > { %1139 = vst.msk [vmem:[%s2028_s18 + $0x60] sm:$0xff] %vm298_vm0, %v1109_v31  ;;  %v1302_v41 = vadd.f32 %v1301_v17, %v1300_v5 }
 0x315   : > { %v1303_v48 = vpop.f32.mrf.mxu1 }
 0x316   : > { %v1114_v14 = vadd.f32 %v1302_v41, %v2021_v16 }
 0x317   : > { %v1304_v15 = vpop.f32.mrf.mxu1 }
 0x318   : > { %1140 = vst.msk [vmem:[%s2028_s18 + $0x68] sm:$0xff] %vm298_vm0, %v1114_v14  ;;  %v1305_v18 = vadd.f32 %v1304_v15, %v1303_v48 }
 0x319   : > { %v1306_v57 = vpop.f32.mrf.mxu1 }
 0x31a   : > { %v1119_v19 = vadd.f32 %v1305_v18, %v2021_v16 }
 0x31b   : > { %v1307_v22 = vpop.f32.mrf.mxu1 }
 0x31c   : > { %1141 = vst.msk [vmem:[%s2028_s18 + $0x70] sm:$0xff] %vm298_vm0, %v1119_v19  ;;  %v1308_v61 = vadd.f32 %v1307_v22, %v1306_v57 }
 0x31e   : > { %v1124_v35 = vadd.f32 %v1308_v61, %v2021_v16 }
 0x320   : > { %1142 = vst.msk [vmem:[%s2028_s18 + $0x78] sm:$0xff] %vm298_vm0, %v1124_v35 }
 0x321 PF: > { %s17_s24 = sadd.s32 1, %s1452_s24  }
 0x322   : > { %p14_p4 = scmp.ge.s32.totalorder %s17_s24, 6  }
 0x324   :  { %16 = sbr.rel (!%p14_p4) target bundleno = 1 (0x1), region = 78 }

</bundles_post_ra>
